<compile_context>
chip_gen: v5e
topology: v5e:2x2
jax: 0.10.0
libtpu: 0.0.40
codegen_flags: <defaults>
</compile_context>

<pallas_src>
import functools

import jax
import jax.numpy as jnp
from jax.experimental import pallas as pl
from jax.experimental.pallas import tpu as pltpu

# ---- model config (small, consistent with Net(input=2, width, length, lb, ub)) ----
BATCH = 8
IN_DIM = 2
WIDTH = 32
LENGTH = 3          # number of hidden Linear(width, width) layers
LB = -1.0
UB = 1.0


def _net_kernel(x_ref, w_in_t_ref, b_in_ref, w_h_t_ref, b_h_ref,
                w_out_t_ref, b_out_ref, o_ref, *, in_dim, length):
    # Transposed dataflow: batch on lanes.
    #   x_ref:      (in_dim, TM)
    #   activations (WIDTH,  TM)   -> all 128 lanes busy for tanh / bias / store
    x = x_ref[...]

    # Input layer on the VPU: K=in_dim (=2) broadcast multiply-adds instead of a
    # degenerate MXU matmul.  Normalization is already folded into w_in/b_in.
    h = b_in_ref[...] + w_in_t_ref[:, 0:1] * x[0:1, :]          # (WIDTH, TM)
    for k in range(1, in_dim):
        h = h + w_in_t_ref[:, k:k + 1] * x[k:k + 1, :]
    h = jnp.tanh(h)

    # Hidden layers on the MXU: (W, W) @ (W, TM) -> (W, TM), f32 accumulation.
    for i in range(length):
        h = jnp.tanh(
            jnp.dot(w_h_t_ref[i], h, preferred_element_type=jnp.float32)
            + b_h_ref[i]                                        # (WIDTH, 1) lane-broadcast
        )

    # Output layer: (1, W) @ (W, TM) -> lane-dense (1, TM); the MXU is idle anyway.
    o_ref[...] = (
        jnp.dot(w_out_t_ref[...], h, preferred_element_type=jnp.float32)
        + b_out_ref[0, 0]                                       # SMEM scalar
    )


def net_forward(x, lb, ub, w_in, b_in, w_h, b_h, w_out, b_out, *, tm=2048):
    n, in_dim = x.shape
    width = w_in.shape[1]
    length = w_h.shape[0]

    # --- host-side folding of the normalization into the first Linear ---
    # x_norm = s*x + t,  s = 2/(ub-lb),  t = -s*lb - 1
    s = jnp.broadcast_to(2.0 / (ub - lb), (1, in_dim)).astype(jnp.float32)
    t = (-s * jnp.broadcast_to(lb, (1, in_dim)) - 1.0).astype(jnp.float32)
    w_in_f = s.reshape(in_dim, 1) * w_in                        # (in_dim, width)
    b_in_f = b_in + t @ w_in                                    # (1, width)

    # --- transposed (batch-on-lanes) parameter layouts ---
    w_in_t = w_in_f.T                                           # (width, in_dim)
    b_in_t = b_in_f.reshape(width, 1)                           # (width, 1)
    w_h_t = jnp.transpose(w_h, (0, 2, 1))                       # (length, width, width)
    b_h_t = b_h.reshape(length, width, 1)                       # (length, width, 1)
    w_out_t = w_out.reshape(1, width)                           # (1, width)
    b_out_s = b_out.reshape(1, 1)                               # SMEM scalar

    # --- row-tile sizing ---
    # Lane-dense tiles (multiple of 128); clamp for small batches so BATCH=8
    # doesn't pad to thousands of redundant rows; keep >=2 grid steps when
    # N > 128 so the "parallel" axis can shard across v7x's two TensorCores.
    def rup(v, m):
        return ((v + m - 1) // m) * m

    tm = min(tm, rup(max(n, 1), 128))
    if n > 128:
        tm = min(tm, rup(pl.cdiv(n, 2), 128))
    tm = max(tm, 128)

    g = pl.cdiv(n, tm)
    n_pad = g * tm

    x_t = x.T                                                   # (in_dim, n)
    if n_pad != n:
        x_t = jnp.pad(x_t, ((0, 0), (0, n_pad - n)))            # padded cols -> garbage, sliced off

    def whole(shape):
        # Whole-array, constant-index block: fetched once, VMEM-resident across grid.
        return pl.BlockSpec(shape, lambda i, _s=shape: (0,) * len(_s))

    kernel = functools.partial(_net_kernel, in_dim=in_dim, length=length)

    out = pl.pallas_call(
        kernel,
        out_shape=jax.ShapeDtypeStruct((1, n_pad), jnp.float32),
        grid=(g,),
        in_specs=[
            pl.BlockSpec((in_dim, tm), lambda i: (0, i)),       # x^T column tile
            whole((width, in_dim)),                             # w_in^T (folded)
            whole((width, 1)),                                  # b_in (folded, column)
            whole((length, width, width)),                      # stacked hidden weights, transposed
            whole((length, width, 1)),                          # stacked hidden biases, columns
            whole((1, width)),                                  # w_out^T
            pl.BlockSpec(memory_space=pltpu.MemorySpace.SMEM),  # b_out scalar
        ],
        out_specs=pl.BlockSpec((1, tm), lambda i: (0, i)),      # lane-dense output block
        compiler_params=pltpu.CompilerParams(
            dimension_semantics=("parallel",),
        ),
    )(x_t, w_in_t, b_in_t, w_h_t, b_h_t, w_out_t, b_out_s)

    return out[0, :n].reshape(n, 1)


def init_params(key):
    """Deterministic init mimicking PyTorch Linear default (U[-1/sqrt(fan_in), +])."""
    ks = jax.random.split(key, 2 * (LENGTH + 2))
    ki = iter(ks)

    def linear(fan_in, fan_out):
        bound = 1.0 / jnp.sqrt(jnp.float32(fan_in))
        w = jax.random.uniform(next(ki), (fan_in, fan_out), jnp.float32, -bound, bound)
        b = jax.random.uniform(next(ki), (1, fan_out), jnp.float32, -bound, bound)
        return w, b

    w_in, b_in = linear(IN_DIM, WIDTH)
    hs = [linear(WIDTH, WIDTH) for _ in range(LENGTH)]
    w_h = jnp.stack([w for w, _ in hs])                         # (LENGTH, WIDTH, WIDTH)
    b_h = jnp.stack([b for _, b in hs])                         # (LENGTH, 1, WIDTH)
    w_out, b_out = linear(WIDTH, 1)
    return w_in, b_in, w_h, b_h, w_out, b_out


def reference_forward(x, lb, ub, w_in, b_in, w_h, b_h, w_out, b_out):
    x = 2.0 * (x - lb) / (ub - lb) - 1.0
    h = jnp.tanh(x @ w_in + b_in)
    for i in range(LENGTH):
        h = jnp.tanh(h @ w_h[i] + b_h[i])
    return h @ w_out + b_out


if __name__ == "__main__":
    key = jax.random.PRNGKey(0)
    k_x, k_p = jax.random.split(key)

    x = jax.random.uniform(k_x, (BATCH, IN_DIM), jnp.float32)   # like torch.rand(N, 2)
    lb = jnp.full((1, 1), LB, jnp.float32)
    ub = jnp.full((1, 1), UB, jnp.float32)

    w_in, b_in, w_h, b_h, w_out, b_out = init_params(k_p)

    out = net_forward(x, lb, ub, w_in, b_in, w_h, b_h, w_out, b_out)
    out = jax.block_until_ready(out)

    ref = reference_forward(x, lb, ub, w_in, b_in, w_h, b_h, w_out, b_out)
    assert out.shape == (BATCH, 1), out.shape
    assert jnp.allclose(out, ref, atol=1e-5, rtol=1e-5), "mismatch vs reference"

    print("KERNEL_OK")
</pallas_src>

<mosaic_0001>
module attributes {stable_mosaic.version = 11 : i64} {
  func.func @_net_kernel(%arg0: i32, %arg1: memref<2x128xf32, #tpu.memory_space<vmem>>, %arg2: memref<32x2xf32, #tpu.memory_space<vmem>>, %arg3: memref<32x1xf32, #tpu.memory_space<vmem>>, %arg4: memref<3x32x32xf32, #tpu.memory_space<vmem>>, %arg5: memref<3x32x1xf32, #tpu.memory_space<vmem>>, %arg6: memref<1x32xf32, #tpu.memory_space<vmem>>, %arg7: memref<1x1xf32, #tpu.memory_space<smem>>, %arg8: memref<1x128xf32, #tpu.memory_space<vmem>>) attributes {dimension_semantics = [#tpu.dimension_semantics<parallel>], iteration_bounds = array<i64: 1>, scalar_prefetch = 0 : i64, scratch_operands = 0 : i64, tpu.core_type = #tpu.core_type<tc>, window_params = [{transform_indices = @transform_0, window_bounds = array<i64: 2, 128>}, {pipeline_mode = #tpu.pipeline_mode<synchronous>, transform_indices = @transform_1, window_bounds = array<i64: 32, 2>}, {pipeline_mode = #tpu.pipeline_mode<synchronous>, transform_indices = @transform_2, window_bounds = array<i64: 32, 1>}, {pipeline_mode = #tpu.pipeline_mode<synchronous>, transform_indices = @transform_3, window_bounds = array<i64: 3, 32, 32>}, {pipeline_mode = #tpu.pipeline_mode<synchronous>, transform_indices = @transform_4, window_bounds = array<i64: 3, 32, 1>}, {pipeline_mode = #tpu.pipeline_mode<synchronous>, transform_indices = @transform_5, window_bounds = array<i64: 1, 32>}, {transform_indices = @transform_6, window_bounds = array<i64: 1, 1>}, {transform_indices = @transform_7, window_bounds = array<i64: 1, 128>}]} {
    %c0 = arith.constant 0 : index
    %c0_0 = arith.constant 0 : index
    %0 = vector.load %arg1[%c0, %c0_0] : memref<2x128xf32, #tpu.memory_space<vmem>>, vector<2x128xf32>
    %c0_1 = arith.constant 0 : index
    %c0_2 = arith.constant 0 : index
    %1 = vector.load %arg3[%c0_1, %c0_2] : memref<32x1xf32, #tpu.memory_space<vmem>>, vector<32x1xf32>
    %c0_3 = arith.constant 0 : index
    %c0_4 = arith.constant 0 : index
    %2 = vector.load %arg2[%c0_3, %c0_4] : memref<32x2xf32, #tpu.memory_space<vmem>>, vector<32x1xf32>
    %3 = vector.extract_strided_slice %0 {offsets = [0, 0], sizes = [1, 128], strides = [1, 1]} : vector<2x128xf32> to vector<1x128xf32>
    %4 = vector.broadcast %2 : vector<32x1xf32> to vector<32x128xf32>
    %5 = vector.broadcast %3 : vector<1x128xf32> to vector<32x128xf32>
    %6 = arith.mulf %4, %5 : vector<32x128xf32>
    %7 = vector.broadcast %1 : vector<32x1xf32> to vector<32x128xf32>
    %8 = arith.addf %7, %6 : vector<32x128xf32>
    %c0_5 = arith.constant 0 : index
    %c1 = arith.constant 1 : index
    %9 = vector.load %arg2[%c0_5, %c1] : memref<32x2xf32, #tpu.memory_space<vmem>>, vector<32x1xf32>
    %10 = vector.extract_strided_slice %0 {offsets = [1, 0], sizes = [1, 128], strides = [1, 1]} : vector<2x128xf32> to vector<1x128xf32>
    %11 = vector.broadcast %9 : vector<32x1xf32> to vector<32x128xf32>
    %12 = vector.broadcast %10 : vector<1x128xf32> to vector<32x128xf32>
    %13 = arith.mulf %11, %12 : vector<32x128xf32>
    %14 = arith.addf %8, %13 : vector<32x128xf32>
    %15 = math.tanh %14 : vector<32x128xf32>
    %c0_6 = arith.constant 0 : index
    %c0_7 = arith.constant 0 : index
    %c0_8 = arith.constant 0 : index
    %16 = vector.load %arg4[%c0_6, %c0_7, %c0_8] : memref<3x32x32xf32, #tpu.memory_space<vmem>>, vector<1x32x32xf32>
    %17 = vector.shape_cast %16 : vector<1x32x32xf32> to vector<32x32xf32>
    %cst = arith.constant dense<0.000000e+00> : vector<32x128xf32>
    %18 = tpu.matmul %17, %15, %cst {dimension_numbers = #tpu.dot_dimension_numbers<[1], [0], [0], [1], [0, 0, 1, 1], [], []>} : vector<32x32xf32>, vector<32x128xf32>, vector<32x128xf32> -> vector<32x128xf32>
    %c0_9 = arith.constant 0 : index
    %c0_10 = arith.constant 0 : index
    %c0_11 = arith.constant 0 : index
    %19 = vector.load %arg5[%c0_9, %c0_10, %c0_11] : memref<3x32x1xf32, #tpu.memory_space<vmem>>, vector<1x32x1xf32>
    %20 = vector.shape_cast %19 : vector<1x32x1xf32> to vector<32x1xf32>
    %21 = vector.broadcast %20 : vector<32x1xf32> to vector<32x128xf32>
    %22 = arith.addf %18, %21 : vector<32x128xf32>
    %23 = math.tanh %22 : vector<32x128xf32>
    %c1_12 = arith.constant 1 : index
    %c0_13 = arith.constant 0 : index
    %c0_14 = arith.constant 0 : index
    %24 = vector.load %arg4[%c1_12, %c0_13, %c0_14] : memref<3x32x32xf32, #tpu.memory_space<vmem>>, vector<1x32x32xf32>
    %25 = vector.shape_cast %24 : vector<1x32x32xf32> to vector<32x32xf32>
    %cst_15 = arith.constant dense<0.000000e+00> : vector<32x128xf32>
    %26 = tpu.matmul %25, %23, %cst_15 {dimension_numbers = #tpu.dot_dimension_numbers<[1], [0], [0], [1], [0, 0, 1, 1], [], []>} : vector<32x32xf32>, vector<32x128xf32>, vector<32x128xf32> -> vector<32x128xf32>
    %c1_16 = arith.constant 1 : index
    %c0_17 = arith.constant 0 : index
    %c0_18 = arith.constant 0 : index
    %27 = vector.load %arg5[%c1_16, %c0_17, %c0_18] : memref<3x32x1xf32, #tpu.memory_space<vmem>>, vector<1x32x1xf32>
    %28 = vector.shape_cast %27 : vector<1x32x1xf32> to vector<32x1xf32>
    %29 = vector.broadcast %28 : vector<32x1xf32> to vector<32x128xf32>
    %30 = arith.addf %26, %29 : vector<32x128xf32>
    %31 = math.tanh %30 : vector<32x128xf32>
    %c2 = arith.constant 2 : index
    %c0_19 = arith.constant 0 : index
    %c0_20 = arith.constant 0 : index
    %32 = vector.load %arg4[%c2, %c0_19, %c0_20] : memref<3x32x32xf32, #tpu.memory_space<vmem>>, vector<1x32x32xf32>
    %33 = vector.shape_cast %32 : vector<1x32x32xf32> to vector<32x32xf32>
    %cst_21 = arith.constant dense<0.000000e+00> : vector<32x128xf32>
    %34 = tpu.matmul %33, %31, %cst_21 {dimension_numbers = #tpu.dot_dimension_numbers<[1], [0], [0], [1], [0, 0, 1, 1], [], []>} : vector<32x32xf32>, vector<32x128xf32>, vector<32x128xf32> -> vector<32x128xf32>
    %c2_22 = arith.constant 2 : index
    %c0_23 = arith.constant 0 : index
    %c0_24 = arith.constant 0 : index
    %35 = vector.load %arg5[%c2_22, %c0_23, %c0_24] : memref<3x32x1xf32, #tpu.memory_space<vmem>>, vector<1x32x1xf32>
    %36 = vector.shape_cast %35 : vector<1x32x1xf32> to vector<32x1xf32>
    %37 = vector.broadcast %36 : vector<32x1xf32> to vector<32x128xf32>
    %38 = arith.addf %34, %37 : vector<32x128xf32>
    %39 = math.tanh %38 : vector<32x128xf32>
    %c0_25 = arith.constant 0 : index
    %c0_26 = arith.constant 0 : index
    %40 = vector.load %arg6[%c0_25, %c0_26] : memref<1x32xf32, #tpu.memory_space<vmem>>, vector<1x32xf32>
    %cst_27 = arith.constant dense<0.000000e+00> : vector<1x128xf32>
    %41 = tpu.matmul %40, %39, %cst_27 {dimension_numbers = #tpu.dot_dimension_numbers<[1], [0], [0], [1], [0, 0, 1, 1], [], []>} : vector<1x32xf32>, vector<32x128xf32>, vector<1x128xf32> -> vector<1x128xf32>
    %c0_28 = arith.constant 0 : index
    %c0_29 = arith.constant 0 : index
    %42 = memref.load %arg7[%c0_28, %c0_29] : memref<1x1xf32, #tpu.memory_space<smem>>
    %43 = vector.broadcast %42 : f32 to vector<1x128xf32>
    %44 = arith.addf %41, %43 : vector<1x128xf32>
    %c0_30 = arith.constant 0 : index
    %c0_31 = arith.constant 0 : index
    %45 = vector.load %arg8[%c0_30, %c0_31] : memref<1x128xf32, #tpu.memory_space<vmem>>, vector<1x128xf32>
    tpu.vector_store %arg8[%c0_30, %c0_31], %44 {strides = array<i32>} : memref<1x128xf32, #tpu.memory_space<vmem>>, vector<1x128xf32>,
    return
  }
  func.func @transform_0(%arg0: i32) -> (i32, i32) {
    %c0_i32 = arith.constant 0 : i32
    %c0_i32_0 = arith.constant 0 : i32
    return %c0_i32, %arg0 : i32, i32
  }
  func.func @transform_1(%arg0: i32) -> (i32, i32) {
    %c0_i32 = arith.constant 0 : i32
    %c0_i32_0 = arith.constant 0 : i32
    %c0_i32_1 = arith.constant 0 : i32
    return %c0_i32, %c0_i32_0 : i32, i32
  }
  func.func @transform_2(%arg0: i32) -> (i32, i32) {
    %c0_i32 = arith.constant 0 : i32
    %c0_i32_0 = arith.constant 0 : i32
    %c0_i32_1 = arith.constant 0 : i32
    return %c0_i32, %c0_i32_0 : i32, i32
  }
  func.func @transform_3(%arg0: i32) -> (i32, i32, i32) {
    %c0_i32 = arith.constant 0 : i32
    %c0_i32_0 = arith.constant 0 : i32
    %c0_i32_1 = arith.constant 0 : i32
    %c0_i32_2 = arith.constant 0 : i32
    return %c0_i32, %c0_i32_0, %c0_i32_1 : i32, i32, i32
  }
  func.func @transform_4(%arg0: i32) -> (i32, i32, i32) {
    %c0_i32 = arith.constant 0 : i32
    %c0_i32_0 = arith.constant 0 : i32
    %c0_i32_1 = arith.constant 0 : i32
    %c0_i32_2 = arith.constant 0 : i32
    return %c0_i32, %c0_i32_0, %c0_i32_1 : i32, i32, i32
  }
  func.func @transform_5(%arg0: i32) -> (i32, i32) {
    %c0_i32 = arith.constant 0 : i32
    %c0_i32_0 = arith.constant 0 : i32
    %c0_i32_1 = arith.constant 0 : i32
    return %c0_i32, %c0_i32_0 : i32, i32
  }
  func.func @transform_6(%arg0: i32) -> (i32, i32) {
    %c0_i32 = arith.constant 0 : i32
    %c0_i32_0 = arith.constant 0 : i32
    %c0_i32_1 = arith.constant 0 : i32
    return %c0_i32, %c0_i32_0 : i32, i32
  }
  func.func @transform_7(%arg0: i32) -> (i32, i32) {
    %c0_i32 = arith.constant 0 : i32
    %c0_i32_0 = arith.constant 0 : i32
    return %c0_i32, %arg0 : i32, i32
  }
}

</mosaic_0001>

<bundles_post_ra>
// kernel: tpu_custom_call.1
= control target key start
LH: loop header
LB: loop body
LE: loop exit
PB: predicated region body
PF: predicated region fallthrough
CT: control target
= control target key end

     0   :  { %v481_v3 = vmov 0   ;;  %s645_s0 = inlined_call_operand.vmem [shape: f32[2,128], index: 0, kind: input, shape index: {}]   ;;  %s646_s1 = inlined_call_operand.vmem [shape: f32[32,2], index: 1, kind: input, shape index: {}]   ;;  %s647_s2 = inlined_call_operand.vmem [shape: f32[32,1], index: 2, kind: input, shape index: {}]   ;;  %s648_s3 = inlined_call_operand.vmem [shape: f32[3,32,32], index: 3, kind: input, shape index: {}]   ;;  %s649_s4 = inlined_call_operand.vmem [shape: f32[3,32,1], index: 4, kind: input, shape index: {}]   ;;  %s650_s5 = inlined_call_operand.vmem [shape: f32[1,32], index: 5, kind: input, shape index: {}]   ;;  %s651_s6 = inlined_call_operand.<no memory space> [shape: f32[1,1], index: 6, kind: input, shape index: {}]   ;;  %s652_s7 = inlined_call_operand.hbm [shape: f32[1,128], index: 7, kind: output, shape index: {}]  }
   0x1   :  { %v36_v0 = vld [vmem:[%s646_s1 + $0x18] sm:$0xff]  ;;  %v34_v1 = vld [vmem:[%s646_s1 + $0x8] sm:$0xff]  ;;  %417 = vset.pattern.permute.xlu2 %v481_v3  ;;  %415 = vset.pattern.permute.xlu1 %v481_v3 }
   0x2   :  { %v32_v2 = vld [vmem:[%s647_s2 + $0x18] sm:$0xff]  ;;  %414 = vset.pattern.permute.xlu0 %v481_v3  ;;  %44 = vperm.xlu2 %417, %v34_v1  }
   0x3   :  { %54 = vperm.xlu0 %414, %v36_v0   ;;  %79 = vperm.xlu1 %415, %v32_v2  }
   0x4   :  { %13 = vsyncpa [#allocation4], 0  ;;  %v31_v4 = vld [vmem:[%s647_s2 + $0x10] sm:$0xff]  ;;  %v482_v6 = vmov 1   ;;  %v30_v7 = vld [vmem:[%s647_s2 + $0x8] sm:$0xff]  ;;  %vm143_vm0 = vcmask 261120  }
   0x5   :  { %v35_v5 = vld [vmem:[%s646_s1 + $0x10] sm:$0xff]  ;;  %v33_v8 = vld [vmem:[%s646_s1] sm:$0xff]  ;;  %v393_v11 = vld [vmem:[%s649_s4 + $0x38] sm:$0xff]  ;;  %s483_s17 = smov [#allocation3]   ;;  %s373_s20 = sshll.u32 %s652_s7, 4  ;;  %s374_s20 = int_to_ptr.hbm [resolvable:$true] %s373_s20 }
   0x6   :  { %v29_v9 = vld [vmem:[%s647_s2] sm:$0xff]  ;;  %v121_v10 = vld [vmem:[%s649_s4 + $0x10] sm:$0xff]  ;;  %v391_v12 = vld [vmem:[%s649_s4 + $0x28] sm:$0xff]  ;;  %s371_s18 = sshll.u32 %s483_s17, 4  ;;  %s372_s18 = int_to_ptr.vmem [resolvable:$true] %s371_s18 }
   0x7   :  { %v404_v13 = vld [vmem:[%s649_s4 + $0x50] sm:$0xff]  ;;  %v28_v15 = vld [vmem:[%s645_s0] sm:$0x3]  ;;  %v122_v26 = vld [vmem:[%s649_s4 + $0x18] sm:$0xff] }
   0x8   :  { %v57_v18 = vperm.slane %v28_v15, 0  ;;  %v102_v20 = vperm.slane %v28_v15, 1  ;;  %v119_v34 = vld [vmem:[%s649_s4] sm:$0xff]  ;;  %v392_v41 = vld [vmem:[%s649_s4 + $0x30] sm:$0xff]  ;;  %v120_v42 = vld [vmem:[%s649_s4 + $0x8] sm:$0xff] }
   0x9   :  { %v405_v51 = vld [vmem:[%s649_s4 + $0x58] sm:$0xff]  ;;  %v390_v52 = vld [vmem:[%s649_s4 + $0x20] sm:$0xff]  ;;  %v403_v57 = vld [vmem:[%s649_s4 + $0x48] sm:$0xff] }
   0xa   :  { %74 = vperm.xlu2 %417, %v31_v4   ;;  %v115_v54 = vld [vmem:[%s648_s3] sm:$0xff]  ;;  %v116_v58 = vld [vmem:[%s648_s3 + $0x8] sm:$0xff]  ;;  %v117_v59 = vld [vmem:[%s648_s3 + $0x10] sm:$0xff] }
   0xb   :  { %49 = vperm.xlu0 %414, %v35_v5   ;;  %416 = vset.pattern.permute.xlu1 %v482_v6  ;;  %v402_v56 = vld [vmem:[%s649_s4 + $0x40] sm:$0xff]  ;;  %v118_v60 = vld [vmem:[%s648_s3 + $0x18] sm:$0xff]  ;;  %v388_v15 = vld [vmem:[%s648_s3 + $0x30] sm:$0xff] }
   0xc   :  { %99 = vperm.xlu1 %416, %v36_v0  }
  0x12   :  { %69 = vperm.xlu2 %417, %v30_v7  }
  0x13   :  { %418 = vset.pattern.permute.xlu0 %v482_v6 }
  0x14   :  { %95 = vperm.xlu0 %418, %v35_v5   ;;  %419 = vset.pattern.permute.xlu1 %v481_v3 }
  0x15   :  { %39 = vperm.xlu1 %419, %v33_v8  }
  0x1a   :  { %64 = vperm.xlu2 %417, %v29_v9  }
  0x1c   :  { %87 = vperm.xlu0 %418, %v33_v8  }
  0x1d   :  { %420 = vset.pattern.permute.xlu1 %v482_v6 }
  0x1e   :  { %91 = vperm.xlu1 %420, %v34_v1  }
  0x22   :  { %135 = vperm.xlu2 %417, %v121_v10  }
  0x24   :  { %422 = vset.pattern.permute.xlu0 %v481_v3 }
  0x25   :  { %130 = vperm.xlu0 %422, %v120_v42  }
  0x26   :  { %421 = vset.pattern.permute.xlu1 %v481_v3 }
  0x27   :  { %140 = vperm.xlu1 %421, %v122_v26  }
  0x2a   :  { %216 = vperm.xlu2 %417, %v393_v11  }
  0x2d   :  { %201 = vperm.xlu0 %422, %v390_v52   ;;  %v339_v52 = vld [vmem:[%s650_s5] sm:$0x1] }
  0x2f   :  { %125 = vperm.xlu1 %421, %v119_v34   ;;  %v399_v34 = vld [vmem:[%s648_s3 + $0x48] sm:$0xff] }
  0x32   :  { %206 = vperm.xlu2 %417, %v391_v12   ;;  %v386_v12 = vld [vmem:[%s648_s3 + $0x20] sm:$0xff] }
  0x35   :  { %281 = vperm.xlu0 %422, %v403_v57  }
  0x37   :  { %211 = vperm.xlu1 %421, %v392_v41  }
  0x3a   :  { %286 = vperm.xlu2 %417, %v404_v13  }
  0x3f   :  { %291 = vperm.xlu1 %421, %v405_v51  }
  0x47   :  { %276 = vperm.xlu1 %421, %v402_v56  }
  0x5c   :  { %v45_v14 = vpop.permute.xlu2 %44 }
  0x5d   :  { %v59_v37 = vmul.f32 %v57_v18, %v45_v14  ;;  %v387_v14 = vld [vmem:[%s648_s3 + $0x28] sm:$0xff] }
  0x64   :  { %v75_v21 = vpop.permute.xlu2 %74 }
  0x6c   :  { %v70_v29 = vpop.permute.xlu2 %69 }
  0x6d   :  { %v83_v46 = vadd.f32 %v70_v29, %v59_v37 }
  0x74   :  { %v65_v43 = vpop.permute.xlu2 %64 }
  0x75   :  { %v55_v16 = vpop.permute.xlu0 %54  ;;  %v80_v17 = vpop.permute.xlu1 %79 }
  0x76   :  { %v61_v19 = vmul.f32 %v57_v18, %v55_v16  ;;  %v389_v16 = vld [vmem:[%s648_s3 + $0x38] sm:$0xff] }
  0x78   :  { %v85_v24 = vadd.f32 %v80_v17, %v61_v19 }
  0x7c   :  { %v136_v1 = vpop.permute.xlu2 %135 }
  0x7d   :  { %v50_v22 = vpop.permute.xlu0 %49 }
  0x7e   :  { %v100_v23 = vpop.permute.xlu1 %99  ;;  %v60_v28 = vmul.f32 %v57_v18, %v50_v22 }
  0x7f   :  { %v106_v25 = vmul.f32 %v102_v20, %v100_v23 }
  0x80   :  { %v84_v31 = vadd.f32 %v75_v21, %v60_v28 }
  0x81   :  { %v110_v27 = vadd.f32 %v106_v25, %v85_v24 }
  0x83   :  { %423 = vtanh.f32 %v110_v27 }
  0x84   :  { %v217_v19 = vpop.permute.xlu2 %216 }
  0x86   :  { %v96_v30 = vpop.permute.xlu0 %95 }
  0x87   :  { %v105_v32 = vmul.f32 %v102_v20, %v96_v30  ;;  %v40_v33 = vpop.permute.xlu1 %39 }
  0x88   :  { %v58_v38 = vmul.f32 %v57_v18, %v40_v33 }
  0x89   :  { %v424_v35 = vpop.eup %423  ;;  %v109_v36 = vadd.f32 %v105_v32, %v84_v31  ;;  %v398_v32 = vld [vmem:[%s648_s3 + $0x40] sm:$0xff] }
  0x8a   :  { %168 = vmatpush.msra.mxu0 %v424_v35  ;;  %v82_v47 = vadd.f32 %v65_v43, %v58_v38  ;;  %v400_v35 = vld [vmem:[%s648_s3 + $0x50] sm:$0xff] }
  0x8b   :  { %425 = vtanh.f32 %v109_v36  ;;  %v401_v36 = vld [vmem:[%s648_s3 + $0x58] sm:$0xff] }
  0x8c   :  { %v207_v25 = vpop.permute.xlu2 %206 }
  0x8e   :  { %v88_v39 = vpop.permute.xlu0 %87 }
  0x8f   :  { %v103_v40 = vmul.f32 %v102_v20, %v88_v39 }
  0x90   :  { %v92_v44 = vpop.permute.xlu1 %91 }
  0x91   :  { %v426_v45 = vpop.eup %425  ;;  %v104_v48 = vmul.f32 %v102_v20, %v92_v44  ;;  %v107_v49 = vadd.f32 %v103_v40, %v82_v47 }
  0x92   :  { %169 = vmatpush.msra.mxu0 %v426_v45 }
  0x93   :  { %v108_v50 = vadd.f32 %v104_v48, %v83_v46 }
  0x94   :  { %v287_v41 = vpop.permute.xlu2 %286 }
  0x95   :  { %427 = vtanh.f32 %v108_v50 }
  0x96   :  { %429 = vtanh.f32 %v107_v49 }
  0x97   :  { %v131_v2 = vpop.permute.xlu0 %130 }
  0x99   :  { %v141_v0 = vpop.permute.xlu1 %140 }
  0x9b   :  { %v428_v53 = vpop.eup %427 }
  0x9c   :  { %170 = vmatpush.msra.mxu0 %v428_v53  ;;  %v430_v55 = vpop.eup %429 }
  0x9e   :  { %171 = vmatpush.msra.mxu0 %v430_v55 }
  0x9f   :  { %382 = vmatmul.msk.f32.vlgmr.msra.gmra.mxu0 %vm143_vm0, %v115_v54  ;;  %v202_v27 = vpop.permute.xlu0 %201  ;;  %v341_v54 = vstv %s651_s6 }
  0xa1   :  { %v126_v7 = vpop.permute.xlu1 %125 }
  0xa7   :  { %383 = vmatmul.msk.f32.gmra.mxu0 %vm143_vm0, %v116_v58  ;;  %v282_v45 = vpop.permute.xlu0 %281 }
  0xa9   :  { %v212_v21 = vpop.permute.xlu1 %211 }
  0xaf   :  { %384 = vmatmul.msk.f32.gmra.mxu0 %vm143_vm0, %v117_v59 }
  0xb1   :  { %v292_v40 = vpop.permute.xlu1 %291 }
  0xb7   :  { %385 = vmatmul.msk.f32.gmra.mxu0 %vm143_vm0, %v118_v60 }
  0xb9   :  { %v277_v47 = vpop.permute.xlu1 %276 }
 0x11c   :  { %v173_v61 = vpop.f32.mrf.mxu0 }
 0x11d   :  { %v174_v8 = vadd.f32 %v173_v61, %v126_v7 }
 0x124   :  { %v176_v62 = vpop.f32.mrf.mxu0 }
 0x125   :  { %v177_v6 = vadd.f32 %v176_v62, %v131_v2 }
 0x12c   :  { %v179_v63 = vpop.f32.mrf.mxu0 }
 0x12d   :  { %v180_v4 = vadd.f32 %v179_v63, %v136_v1 }
 0x134   :  { %v182_v3 = vpop.f32.mrf.mxu0 }
 0x135   :  { %v183_v5 = vadd.f32 %v182_v3, %v141_v0 }
 0x137   :  { %431 = vtanh.f32 %v183_v5 }
 0x138   :  { %433 = vtanh.f32 %v180_v4 }
 0x139   :  { %435 = vtanh.f32 %v177_v6 }
 0x13a   :  { %437 = vtanh.f32 %v174_v8 }
 0x13d   :  { %v432_v9 = vpop.eup %431 }
 0x13e   :  { %243 = vmatpush.msra.mxu1 %v432_v9  ;;  %v434_v10 = vpop.eup %433 }
 0x13f   :  { %v436_v11 = vpop.eup %435 }
 0x140   :  { %244 = vmatpush.msra.mxu1 %v434_v10  ;;  %v438_v13 = vpop.eup %437 }
 0x142   :  { %245 = vmatpush.msra.mxu1 %v436_v11 }
 0x144   :  { %246 = vmatpush.msra.mxu1 %v438_v13 }
 0x145   :  { %394 = vmatmul.msk.f32.vlgmr.msra.gmra.mxu1 %vm143_vm0, %v386_v12 }
 0x14d   :  { %395 = vmatmul.msk.f32.gmra.mxu1 %vm143_vm0, %v387_v14 }
 0x155   :  { %396 = vmatmul.msk.f32.gmra.mxu1 %vm143_vm0, %v388_v15 }
 0x15d   :  { %397 = vmatmul.msk.f32.gmra.mxu1 %vm143_vm0, %v389_v16 }
 0x1c2   :  { %v248_v17 = vpop.f32.mrf.mxu1 }
 0x1c3   :  { %v249_v28 = vadd.f32 %v248_v17, %v202_v27 }
 0x1ca   :  { %v251_v18 = vpop.f32.mrf.mxu1 }
 0x1cb   :  { %v252_v26 = vadd.f32 %v251_v18, %v207_v25 }
 0x1d2   :  { %v254_v20 = vpop.f32.mrf.mxu1 }
 0x1d3   :  { %v255_v23 = vadd.f32 %v254_v20, %v212_v21 }
 0x1da   :  { %v257_v22 = vpop.f32.mrf.mxu1 }
 0x1db   :  { %v258_v24 = vadd.f32 %v257_v22, %v217_v19 }
 0x1dd   :  { %439 = vtanh.f32 %v258_v24 }
 0x1de   :  { %441 = vtanh.f32 %v255_v23 }
 0x1df   :  { %443 = vtanh.f32 %v252_v26 }
 0x1e0   :  { %445 = vtanh.f32 %v249_v28 }
 0x1e3   :  { %v440_v29 = vpop.eup %439 }
 0x1e4   :  { %318 = vmatpush.msra.mxu2 %v440_v29  ;;  %v442_v30 = vpop.eup %441 }
 0x1e5   :  { %v444_v31 = vpop.eup %443 }
 0x1e6   :  { %319 = vmatpush.msra.mxu2 %v442_v30  ;;  %v446_v33 = vpop.eup %445 }
 0x1e8   :  { %320 = vmatpush.msra.mxu2 %v444_v31 }
 0x1ea   :  { %321 = vmatpush.msra.mxu2 %v446_v33 }
 0x1eb   :  { %406 = vmatmul.msk.f32.vlgmr.msra.gmra.mxu2 %vm143_vm0, %v398_v32 }
 0x1f3   :  { %407 = vmatmul.msk.f32.gmra.mxu2 %vm143_vm0, %v399_v34 }
 0x1fb   :  { %408 = vmatmul.msk.f32.gmra.mxu2 %vm143_vm0, %v400_v35 }
 0x203   :  { %409 = vmatmul.msk.f32.gmra.mxu2 %vm143_vm0, %v401_v36 }
 0x26e   :  { %v323_v37 = vpop.f32.mrf.mxu2 }
 0x26f   :  { %v324_v48 = vadd.f32 %v323_v37, %v277_v47 }
 0x276   :  { %v326_v38 = vpop.f32.mrf.mxu2 }
 0x277   :  { %v327_v46 = vadd.f32 %v326_v38, %v282_v45 }
 0x27e   :  { %v329_v39 = vpop.f32.mrf.mxu2 }
 0x27f   :  { %v330_v43 = vadd.f32 %v329_v39, %v287_v41 }
 0x286   :  { %v332_v42 = vpop.f32.mrf.mxu2 }
 0x287   :  { %v333_v44 = vadd.f32 %v332_v42, %v292_v40 }
 0x289   :  { %447 = vtanh.f32 %v333_v44 }
 0x28a   :  { %449 = vtanh.f32 %v330_v43 }
 0x28b   :  { %451 = vtanh.f32 %v327_v46 }
 0x28c   :  { %453 = vtanh.f32 %v324_v48 }
 0x28f   :  { %v448_v49 = vpop.eup %447 }
 0x290   :  { %357 = vmatpush.msra.mxu3 %v448_v49  ;;  %v450_v50 = vpop.eup %449 }
 0x291   :  { %v452_v51 = vpop.eup %451 }
 0x292   :  { %358 = vmatpush.msra.mxu3 %v450_v50  ;;  %v454_v53 = vpop.eup %453 }
 0x294   :  { %359 = vmatpush.msra.mxu3 %v452_v51 }
 0x296   :  { %360 = vmatpush.msra.mxu3 %v454_v53 }
 0x297   :  { %410 = vmatmul.msk.f32.vlgmr.msra.gmra.mxu3 %vm143_vm0, %v339_v52 }
 0x31a   :  { %v362_v55 = vpop.f32.mrf.mxu3 }
 0x31b   :  { %v363_v56 = vadd.f32 %v362_v55, %v341_v54 }
 0x31d   :  { %365 = vst [vmem:[#allocation3] sm:$0x1] %v363_v56 }
 0x31e   :  { %376 = dma.vmem_to_hbm [thread:$0]  %s372_s18, 16, %s374_s20, [#allocation4]  }
 0x31f   :  { %479 = dma.done.wait [#allocation4], 16  }
 0x320   :  { %480 = vsyncadd [#allocation4], 4294967280 }
 0x321   :  { %381 = vsyncpa [#allocation4], 1 }

</bundles_post_ra>
